<compile_context>
chip_gen: v5e
topology: v5e:2x2
jax: 0.10.0
libtpu: 0.0.40
codegen_flags: <defaults>
</compile_context>

<pallas_src>
import jax
import jax.numpy as jnp
from jax.experimental import pallas as pl
from jax.experimental.pallas import tpu as pltpu

N_FEATURES = 32          # `n_features` global in the original train.py
HIDDEN = 10
OUT = 1
ROW_TILE_DEFAULT = 16384  # original-x rows per grid step (amortizes per-step overhead)


def _round_up(x, m):
    return ((x + m - 1) // m) * m


def collapsed_linear_kernel(x_ref, w_ref, b_ref, o_ref):
    """One grid step of the collapsed Net forward.

    x_ref: (tile_p, L)  packed input tile: each row holds PACK original rows, lane-dense
    w_ref: (PACK, L)    block-diagonal collapsed weight, resident across grid steps
    b_ref: (1, 1)       collapsed bias, resident
    o_ref: (PACK, tile_p) lane-dense output tile; o[j, r] = y_orig[PACK*r + j]
    """
    # Contract both operands on their last (lane) axis: (PACK, L) x (tile_p, L)
    # -> (PACK, tile_p).  Single MXU push, lane-dense result, no masked 1-lane stores.
    y = jax.lax.dot_general(
        w_ref[...], x_ref[...],
        dimension_numbers=(((1,), (1,)), ((), ())),
        preferred_element_type=jnp.float32,
    )
    o_ref[...] = (y + b_ref[...]).astype(o_ref.dtype)


def net_forward(x, w1, b1, w2, b2, *, row_tile=ROW_TILE_DEFAULT):
    """Pallas forward of Net: fc2(fc1(x)), collapsed to one linear map (exact, no activation)."""
    B, F = x.shape
    assert w1.shape == (F, HIDDEN) and b1.shape == (HIDDEN,)
    assert w2.shape == (HIDDEN, OUT) and b2.shape == (OUT,)

    # Collapse the two activation-free linear layers in the wrapper (tiny XLA ops).
    w_eff = (w1 @ w2).reshape(F)           # (F,)
    b_eff = (b1 @ w2 + b2).reshape(1, 1)   # (1, 1)

    # Packing factor: how many original rows fit in one 128-lane row.
    pack = (128 // F) if (F <= 128 and 128 % F == 0) else 1
    lane_w = pack * F

    # Tiny pad only when B is not a multiple of `pack` (<= pack-1 rows); the big
    # tile-alignment pad copy from the previous version is gone (ragged grid below).
    b_pad = _round_up(B, pack)
    if b_pad != B:
        x = jnp.concatenate([x, jnp.zeros((b_pad - B, F), x.dtype)], axis=0)
    bp = b_pad // pack

    # Free row-major reshape to a lane-dense (bp, 128) view of x.
    xr = x.reshape(bp, lane_w)

    # Block-diagonal collapsed weight: row j carries w_eff in lanes [j*F, (j+1)*F).
    w_blk = jnp.kron(jnp.eye(pack, dtype=x.dtype), w_eff.reshape(1, F))  # (pack, lane_w)

    # Packed-row tile: multiple of 128 (lane-dense output block), or the full array if small.
    tile_p_max = max(128, (row_tile // pack) // 128 * 128)
    tile_p = bp if bp <= tile_p_max else tile_p_max
    grid = (pl.cdiv(bp, tile_p),)  # ragged last block handled by Pallas (no pad copy)

    # TODO(synk): on v7x, use dimension_semantics=(pltpu.CORE_PARALLEL,) to split the
    # batch grid axis across both TensorCores; kept as "parallel" here for portability.
    out_t = pl.pallas_call(
        collapsed_linear_kernel,
        out_shape=jax.ShapeDtypeStruct((pack, bp), x.dtype),
        grid=grid,
        in_specs=[
            pl.BlockSpec((tile_p, lane_w), lambda i: (i, 0)),  # x tile: pipelined over batch
            pl.BlockSpec((pack, lane_w), lambda i: (0, 0)),    # resident block-diag weight
            pl.BlockSpec((1, 1), lambda i: (0, 0)),            # resident collapsed bias
        ],
        out_specs=pl.BlockSpec((pack, tile_p), lambda i: (0, i)),
        compiler_params=pltpu.CompilerParams(
            dimension_semantics=("parallel",),  # batch tiles are independent
        ),
    )(xr, w_blk, b_eff)

    # (pack, bp) -> (bp, pack) -> (b_pad, 1); drop padded rows.  Output is tiny (B floats).
    return out_t.T.reshape(b_pad, OUT)[:B]


def init_params(key, n_features=N_FEATURES):
    """nn.Linear-style init (U(-1/sqrt(fan_in), 1/sqrt(fan_in))); weights stored transposed."""
    k1, k2, k3, k4 = jax.random.split(key, 4)
    bound1 = 1.0 / jnp.sqrt(n_features)
    bound2 = 1.0 / jnp.sqrt(HIDDEN)
    w1 = jax.random.uniform(k1, (n_features, HIDDEN), jnp.float32, -bound1, bound1)
    b1 = jax.random.uniform(k2, (HIDDEN,), jnp.float32, -bound1, bound1)
    w2 = jax.random.uniform(k3, (HIDDEN, OUT), jnp.float32, -bound2, bound2)
    b2 = jax.random.uniform(k4, (OUT,), jnp.float32, -bound2, bound2)
    return w1, b1, w2, b2


if __name__ == "__main__":
    key = jax.random.PRNGKey(0)
    kx, kp, kx2 = jax.random.split(key, 3)
    w1, b1, w2, b2 = init_params(kp)

    def ref_forward(xx):  # plain-JAX reference, same math as the torch module
        return (xx @ w1 + b1[None, :]) @ w2 + b2[None, :]

    # Small batch: single grid step, whole array is one block.
    x_small = jax.random.normal(kx, (8, N_FEATURES), jnp.float32)
    out_small = jax.block_until_ready(net_forward(x_small, w1, b1, w2, b2))
    assert out_small.shape == (8, OUT)
    assert jnp.allclose(out_small, ref_forward(x_small), atol=1e-4, rtol=1e-4), "small-batch mismatch"

    # Larger batch with a small tile override: multi-step grid + ragged last block
    # (2560 rows -> 640 packed rows, tile_p=256 -> grid of 3 with a 128-row ragged tail).
    x_big = jax.random.normal(kx2, (2560, N_FEATURES), jnp.float32)
    out_big = jax.block_until_ready(net_forward(x_big, w1, b1, w2, b2, row_tile=1024))
    assert out_big.shape == (2560, OUT)
    assert jnp.allclose(out_big, ref_forward(x_big), atol=1e-4, rtol=1e-4), "big-batch mismatch"

    # Batch not divisible by the packing factor (exercises the tiny <=3-row pad path).
    x_odd = x_big[:37]
    out_odd = jax.block_until_ready(net_forward(x_odd, w1, b1, w2, b2))
    assert out_odd.shape == (37, OUT)
    assert jnp.allclose(out_odd, ref_forward(x_odd), atol=1e-4, rtol=1e-4), "odd-batch mismatch"

    print("KERNEL_OK")
</pallas_src>

<mosaic_0001>
module attributes {stable_mosaic.version = 11 : i64} {
  func.func @collapsed_linear_kernel(%arg0: i32, %arg1: memref<2x128xf32, #tpu.memory_space<vmem>>, %arg2: memref<4x128xf32, #tpu.memory_space<vmem>>, %arg3: memref<1x1xf32, #tpu.memory_space<vmem>>, %arg4: memref<4x2xf32, #tpu.memory_space<vmem>>) attributes {dimension_semantics = [#tpu.dimension_semantics<parallel>], iteration_bounds = array<i64: 1>, scalar_prefetch = 0 : i64, scratch_operands = 0 : i64, tpu.core_type = #tpu.core_type<tc>, window_params = [{transform_indices = @transform_0, window_bounds = array<i64: 2, 128>}, {pipeline_mode = #tpu.pipeline_mode<synchronous>, transform_indices = @transform_1, window_bounds = array<i64: 4, 128>}, {pipeline_mode = #tpu.pipeline_mode<synchronous>, transform_indices = @transform_2, window_bounds = array<i64: 1, 1>}, {transform_indices = @transform_3, window_bounds = array<i64: 4, 2>}]} {
    %c0 = arith.constant 0 : index
    %c0_0 = arith.constant 0 : index
    %0 = vector.load %arg2[%c0, %c0_0] : memref<4x128xf32, #tpu.memory_space<vmem>>, vector<4x128xf32>
    %c0_1 = arith.constant 0 : index
    %c0_2 = arith.constant 0 : index
    %1 = vector.load %arg1[%c0_1, %c0_2] : memref<2x128xf32, #tpu.memory_space<vmem>>, vector<2x128xf32>
    %cst = arith.constant dense<0.000000e+00> : vector<4x2xf32>
    %2 = tpu.matmul %0, %1, %cst {dimension_numbers = #tpu.dot_dimension_numbers<[1], [1], [0], [0], [0, 0, 1, 0], [], []>} : vector<4x128xf32>, vector<2x128xf32>, vector<4x2xf32> -> vector<4x2xf32>
    %c0_3 = arith.constant 0 : index
    %c0_4 = arith.constant 0 : index
    %3 = vector.load %arg3[%c0_3, %c0_4] : memref<1x1xf32, #tpu.memory_space<vmem>>, vector<1x1xf32>
    %4 = vector.broadcast %3 : vector<1x1xf32> to vector<4x2xf32>
    %5 = arith.addf %2, %4 : vector<4x2xf32>
    %c0_5 = arith.constant 0 : index
    %c0_6 = arith.constant 0 : index
    %6 = vector.load %arg4[%c0_5, %c0_6] : memref<4x2xf32, #tpu.memory_space<vmem>>, vector<4x2xf32>
    tpu.vector_store %arg4[%c0_5, %c0_6], %5 {strides = array<i32>} : memref<4x2xf32, #tpu.memory_space<vmem>>, vector<4x2xf32>,
    return
  }
  func.func @transform_0(%arg0: i32) -> (i32, i32) {
    %c0_i32 = arith.constant 0 : i32
    %c0_i32_0 = arith.constant 0 : i32
    return %arg0, %c0_i32 : i32, i32
  }
  func.func @transform_1(%arg0: i32) -> (i32, i32) {
    %c0_i32 = arith.constant 0 : i32
    %c0_i32_0 = arith.constant 0 : i32
    %c0_i32_1 = arith.constant 0 : i32
    return %c0_i32, %c0_i32_0 : i32, i32
  }
  func.func @transform_2(%arg0: i32) -> (i32, i32) {
    %c0_i32 = arith.constant 0 : i32
    %c0_i32_0 = arith.constant 0 : i32
    %c0_i32_1 = arith.constant 0 : i32
    return %c0_i32, %c0_i32_0 : i32, i32
  }
  func.func @transform_3(%arg0: i32) -> (i32, i32) {
    %c0_i32 = arith.constant 0 : i32
    %c0_i32_0 = arith.constant 0 : i32
    return %c0_i32, %arg0 : i32, i32
  }
}

</mosaic_0001>

<bundles_post_ra>
// kernel: tpu_custom_call.1
= control target key start
LH: loop header
LB: loop body
LE: loop exit
PB: predicated region body
PF: predicated region fallthrough
CT: control target
= control target key end

     0   :  { %s130_s0 = inlined_call_operand.vmem [shape: f32[2,128], index: 0, kind: input, shape index: {}]   ;;  %s131_s1 = inlined_call_operand.hbm [shape: f32[4,128], index: 1, kind: input, shape index: {}]   ;;  %s132_s2 = inlined_call_operand.<no memory space> [shape: f32[1,1], index: 2, kind: input, shape index: {}]   ;;  %s133_s3 = inlined_call_operand.vmem [shape: f32[4,2], index: 3, kind: output, shape index: {}]  }
   0x1   :  { %v8_v0 = vstv %s132_s2 }
   0x2   :  { %9 = vst [vmem:[#allocation2] sm:$0x1] %v8_v0 }
   0x3   :  { %10 = vsyncpa [#allocation4], 0  ;;  %s18_s16 = sshll.u32 %s131_s1, 4  ;;  %s96_s17 = smov [#allocation3]   ;;  %s19_s16 = int_to_ptr.hbm [resolvable:$true] %s18_s16 }
   0x4   :  { %s20_s18 = sshll.u32 %s96_s17, 4  ;;  %s21_s18 = int_to_ptr.vmem [resolvable:$true] %s20_s18 }
   0x5   :  { %23 = dma.hbm_to_vmem [thread:$0]  %s19_s16, 64, %s21_s18, [#allocation4]  }
   0x6   :  { %94 = dma.done.wait [#allocation4], 64  }
   0x7   :  { %95 = vsyncadd [#allocation4], 4294967232  ;;  %v97_v1 = vmov 0   ;;  %v31_v2 = vld [vmem:[%s130_s0] sm:$0x3]  ;;  %vm59_vm0 = vcmask 11264  }
   0x8   :  { %68 = vset.pattern.permute.xlu0 %v97_v1  ;;  %54 = vmatpush.xpose.msra.mxu0 %v31_v2  ;;  %v30_v3 = vld [vmem:[#allocation3] sm:$0xf] }
   0x9   :  { %v69_v4 = vld [vmem:[#allocation2] ss:$0 sm:$0xff] }
   0xa   :  { %36 = vperm.xlu0 %68, %v69_v4  }
   0xb   :  { %55 = vmatmul.f32.vlgmr.msra.gmra.mxu0 %v30_v3 }
  0x7c   :  { %v37_v5 = vpop.permute.xlu0 %36 }
  0x88   :  { %v56_v6 = vpop.f32.mrf.mxu0 }
  0x89   :  { %v57_v7 = vadd.f32 %v56_v6, %v37_v5 }
  0x8b   :  { %60 = vst.msk [vmem:[%s133_s3] sm:$0xf] %vm59_vm0, %v57_v7 }
  0x8c   :  { %65 = vsyncpa [#allocation4], 1 }

</bundles_post_ra>
